<compile_context>
chip_gen: v7x
topology: tpu7x:2x2x1
jax: 0.10.0
libtpu: 0.0.40
codegen_flags: <defaults>
</compile_context>

<pallas_src>
import jax
import jax.numpy as jnp
from jax.experimental import pallas as pl
from jax.experimental.pallas import tpu as pltpu

_LANE = 128  # lane width; batch tiles & packed output rows are multiples of this.


def _round_up(x, m):
    return (x + m - 1) // m * m


def _dqn_kernel(x_ref, wbd_ref, bbr_ref, w1_ref, b1_ref, wot_ref, bo_ref, out_ref):
    # Three branch Linear+ReLU layers fused into a single MXU matmul via the
    # block-diagonal branch weight over the concatenated input (lanes 96->128
    # zero padded so the intermediate is full-lane dense).
    h = jnp.dot(x_ref[...], wbd_ref[...], preferred_element_type=jnp.float32)
    h = jnp.maximum(h + bbr_ref[...], 0.0)

    # fc1 (+ReLU) over the virtual concatenation: one (TB,128)@(128,128) matmul.
    h = jnp.dot(h.astype(w1_ref.dtype), w1_ref[...],
                preferred_element_type=jnp.float32)
    h = jnp.maximum(h + b1_ref[...], 0.0)

    # TODO(synk): training-mode Dropout(p=0.2) not implemented (identity at eval).

    # Output layer with batch on the lane axis: contract wo^T (8, 128) against
    # h (TB, 128) over the hidden dim (trans-B dot, same pattern as the flash
    # 'qd,kd->qk' contraction) -> (8, TB); only row 0 is real.  This packs the
    # whole tile into a single 128-lane-dense row: 4 B/sample HBM writeback
    # instead of 512 B/sample for a lane-padded (TB, 128) f32 slab.
    y = jax.lax.dot_general(
        wot_ref[...], h.astype(wot_ref.dtype),
        dimension_numbers=(((1,), (1,)), ((), ())),
        preferred_element_type=jnp.float32)
    row = y[0:1, :] + bo_ref[...]
    # Clamp so exp(-logit) cannot overflow to +inf before the approx reciprocal
    # (sigmoid(+-30) is already 0/1 to ~1e-13).
    row = jnp.clip(row, -30.0, 30.0)
    out_ref[...] = pl.reciprocal(1.0 + jnp.exp(-row), approx=True)


def prepare_fused_params(params, compute_dtype=jnp.bfloat16):
    """One-time host-side param prep.

    Builds the block-diagonal branch weight over the concatenated input, the
    concatenated fc1 weight, and the transposed output weight; zero-pads all
    weight lane/contraction dims to 128 so every in-kernel intermediate is
    full-lane dense.  Matmul operands are cast to bf16; biases stay f32.
    """
    wb, wc, wct = params["wb"], params["wc"], params["wct"]
    bd, hdim = wb.shape
    cd = wc.shape[0]
    ctd = wct.shape[0]
    d_in = bd + cd + ctd
    h3 = 3 * hdim
    h3p = _round_up(h3, _LANE)   # 96  -> 128
    hp = _round_up(hdim, _LANE)  # 32  -> 128

    # Block-diagonal branch weight, output lanes padded 96 -> 128.
    w_branch = jnp.zeros((d_in, h3p), jnp.float32)
    w_branch = w_branch.at[:bd, :hdim].set(wb)
    w_branch = w_branch.at[bd:bd + cd, hdim:2 * hdim].set(wc)
    w_branch = w_branch.at[bd + cd:, 2 * hdim:h3].set(wct)
    b_branch = jnp.zeros((1, h3p), jnp.float32)
    b_branch = b_branch.at[:, :h3].set(
        jnp.concatenate([params["bb"], params["bc"], params["bct"]], axis=1))

    # fc1: concatenated row blocks, padded to (128, 128).
    w1 = jnp.concatenate([params["w1b"], params["w1c"], params["w1ct"]], axis=0)
    w1p = jnp.zeros((h3p, hp), jnp.float32).at[:h3, :hdim].set(w1)
    b1p = jnp.zeros((1, hp), jnp.float32).at[:, :hdim].set(params["b1"])

    # Output layer, transposed: (out, H) zero-padded to (8, 128).  Only row 0
    # is real; the kernel contracts it against h so the batch lands on lanes.
    wo, bo = params["wo"], params["bo"]          # (H, out), (1, out)
    out_dim = wo.shape[1]
    if out_dim != 1:
        raise NotImplementedError("packed-output kernel assumes output_dim == 1")
    wo_t = jnp.zeros((8, hp), jnp.float32).at[0, :hdim].set(wo[:, 0])
    bo_s = bo.reshape(1, 1).astype(jnp.float32)

    return {
        "w_branch": w_branch.astype(compute_dtype),
        "b_branch": b_branch,
        "w1": w1p.astype(compute_dtype),
        "b1": b1p,
        "wo_t": wo_t.astype(compute_dtype),
        "bo": bo_s,
    }


def skip_prediction_dqn_forward(behavior_x, context_x, content_x, fused, *,
                                block_batch=1024, compute_dtype=jnp.bfloat16):
    """Full SkipPredictionDQN forward pass as one batched Pallas kernel."""
    batch = behavior_x.shape[0]

    # Virtual concat: concatenate once in the wrapper; the block-diagonal
    # branch weight makes the three branch Linears a single matmul.
    x = jnp.concatenate([behavior_x, context_x, content_x], axis=1)
    x = x.astype(compute_dtype)
    d_in = x.shape[1]

    # Batch tiling: tiles are multiples of 128 rows (each tile packs into
    # 128-lane output rows).  Balance tile size against the batch to bound
    # tail-padding waste, and split a single large tile in two so v7x's two
    # TensorCores both get a tile.
    n_target = max(1, pl.cdiv(batch, block_batch))
    tb = _round_up(pl.cdiv(batch, n_target), _LANE)
    if n_target == 1 and tb >= 2 * _LANE and tb % (2 * _LANE) == 0:
        tb //= 2
    padded_batch = _round_up(batch, tb)
    if padded_batch != batch:
        x = jnp.pad(x, ((0, padded_batch - batch), (0, 0)))
    n_tiles = padded_batch // tb

    h3p = fused["w_branch"].shape[1]
    hp = fused["w1"].shape[1]

    flops = 2 * padded_batch * (d_in * h3p + h3p * hp + hp * 8)
    bytes_accessed = int(
        x.size * x.dtype.itemsize
        + sum(int(v.size) * v.dtype.itemsize for v in fused.values())
        + padded_batch * 4)
    cost = pl.CostEstimate(flops=flops,
                           transcendentals=2 * padded_batch,
                           bytes_accessed=bytes_accessed)

    batch_spec = lambda i: (i, 0)   # tile only the batch axis of x
    const_spec = lambda i: (0, 0)   # weights stay VMEM-resident across steps
    out_spec = lambda i: (0, i)     # packed output row, tiled along lanes

    out = pl.pallas_call(
        _dqn_kernel,
        out_shape=jax.ShapeDtypeStruct((1, padded_batch), jnp.float32),
        grid=(n_tiles,),
        in_specs=[
            pl.BlockSpec((tb, d_in), batch_spec),
            pl.BlockSpec(fused["w_branch"].shape, const_spec),
            pl.BlockSpec(fused["b_branch"].shape, const_spec),
            pl.BlockSpec(fused["w1"].shape, const_spec),
            pl.BlockSpec(fused["b1"].shape, const_spec),
            pl.BlockSpec(fused["wo_t"].shape, const_spec),
            pl.BlockSpec(fused["bo"].shape, const_spec),
        ],
        out_specs=pl.BlockSpec((1, tb), out_spec),
        compiler_params=pltpu.CompilerParams(
            dimension_semantics=("parallel",)),
        cost_estimate=cost,
    )(x, fused["w_branch"], fused["b_branch"], fused["w1"], fused["b1"],
      fused["wo_t"], fused["bo"])

    # Unpack the lane-packed row and strip the batch padding.
    return out[0, :batch].reshape(batch, 1)


def init_params(key, behavior_dim, context_dim, content_dim,
                hidden_dim=32, output_dim=1):
    """Deterministic synthetic parameters, stored as (in, out) matrices (f32)."""
    ks = jax.random.split(key, 10)

    def lin(k, fan_in, fan_out):
        kw, kb = jax.random.split(k)
        scale = 1.0 / jnp.sqrt(fan_in)
        w = jax.random.uniform(kw, (fan_in, fan_out), jnp.float32, -scale, scale)
        b = jax.random.uniform(kb, (1, fan_out), jnp.float32, -scale, scale)
        return w, b

    wb, bb = lin(ks[0], behavior_dim, hidden_dim)
    wc, bc = lin(ks[1], context_dim, hidden_dim)
    wct, bct = lin(ks[2], content_dim, hidden_dim)
    w1, b1 = lin(ks[3], hidden_dim * 3, hidden_dim)
    wo, bo = lin(ks[4], hidden_dim, output_dim)

    # fc1 weight split into the three row blocks matching the concat order.
    w1b = w1[:hidden_dim]
    w1c = w1[hidden_dim:2 * hidden_dim]
    w1ct = w1[2 * hidden_dim:]

    return {
        "wb": wb, "bb": bb,
        "wc": wc, "bc": bc,
        "wct": wct, "bct": bct,
        "w1b": w1b, "w1c": w1c, "w1ct": w1ct, "b1": b1,
        "wo": wo, "bo": bo,
    }


def reference_forward(behavior_x, context_x, content_x, params):
    """Pure-JAX f32 reference mirroring the PyTorch forward (eval mode)."""
    b = jax.nn.relu(behavior_x @ params["wb"] + params["bb"])
    c = jax.nn.relu(context_x @ params["wc"] + params["bc"])
    ct = jax.nn.relu(content_x @ params["wct"] + params["bct"])
    w1 = jnp.concatenate([params["w1b"], params["w1c"], params["w1ct"]], axis=0)
    combined = jnp.concatenate([b, c, ct], axis=1)
    h = jax.nn.relu(combined @ w1 + params["b1"])
    return jax.nn.sigmoid(h @ params["wo"] + params["bo"])


if __name__ == "__main__":
    key = jax.random.PRNGKey(0)
    k_b, k_c, k_ct, k_p = jax.random.split(key, 4)

    batch = 8
    behavior_dim, context_dim, content_dim = 16, 24, 8
    hidden_dim, output_dim = 32, 1

    behavior_x = jax.random.normal(k_b, (batch, behavior_dim), jnp.float32)
    context_x = jax.random.normal(k_c, (batch, context_dim), jnp.float32)
    content_x = jax.random.normal(k_ct, (batch, content_dim), jnp.float32)

    params = init_params(k_p, behavior_dim, context_dim, content_dim,
                         hidden_dim=hidden_dim, output_dim=output_dim)
    fused = prepare_fused_params(params)

    out = skip_prediction_dqn_forward(behavior_x, context_x, content_x, fused)
    out = jax.block_until_ready(out)

    ref = reference_forward(behavior_x, context_x, content_x, params)
    assert out.shape == (batch, output_dim)
    # bf16 MXU operands + EUP approx-reciprocal sigmoid vs an f32 reference:
    # error is ~1e-3-level on outputs in [0, 1]; 2e-2 absolute is conservative.
    assert jnp.allclose(out, ref, atol=2e-2, rtol=0.0), "mismatch vs reference"

    print("KERNEL_OK")
</pallas_src>

<mosaic_0001>
module attributes {stable_mosaic.version = 11 : i64} {
  func.func @_dqn_kernel(%arg0: i32, %arg1: memref<128x48xbf16, #tpu.memory_space<vmem>>, %arg2: memref<48x128xbf16, #tpu.memory_space<vmem>>, %arg3: memref<1x128xf32, #tpu.memory_space<vmem>>, %arg4: memref<128x128xbf16, #tpu.memory_space<vmem>>, %arg5: memref<1x128xf32, #tpu.memory_space<vmem>>, %arg6: memref<8x128xbf16, #tpu.memory_space<vmem>>, %arg7: memref<1x1xf32, #tpu.memory_space<vmem>>, %arg8: memref<1x128xf32, #tpu.memory_space<vmem>>) attributes {dimension_semantics = [#tpu.dimension_semantics<parallel>], iteration_bounds = array<i64: 1>, scalar_prefetch = 0 : i64, scratch_operands = 0 : i64, tpu.core_type = #tpu.core_type<tc>, window_params = [{transform_indices = @transform_0, window_bounds = array<i64: 128, 48>}, {pipeline_mode = #tpu.pipeline_mode<synchronous>, transform_indices = @transform_1, window_bounds = array<i64: 48, 128>}, {pipeline_mode = #tpu.pipeline_mode<synchronous>, transform_indices = @transform_2, window_bounds = array<i64: 1, 128>}, {pipeline_mode = #tpu.pipeline_mode<synchronous>, transform_indices = @transform_3, window_bounds = array<i64: 128, 128>}, {pipeline_mode = #tpu.pipeline_mode<synchronous>, transform_indices = @transform_4, window_bounds = array<i64: 1, 128>}, {pipeline_mode = #tpu.pipeline_mode<synchronous>, transform_indices = @transform_5, window_bounds = array<i64: 8, 128>}, {pipeline_mode = #tpu.pipeline_mode<synchronous>, transform_indices = @transform_6, window_bounds = array<i64: 1, 1>}, {transform_indices = @transform_7, window_bounds = array<i64: 1, 128>}]} {
    %c0 = arith.constant 0 : index
    %c0_0 = arith.constant 0 : index
    %0 = vector.load %arg1[%c0, %c0_0] : memref<128x48xbf16, #tpu.memory_space<vmem>>, vector<128x48xbf16>
    %c0_1 = arith.constant 0 : index
    %c0_2 = arith.constant 0 : index
    %1 = vector.load %arg2[%c0_1, %c0_2] : memref<48x128xbf16, #tpu.memory_space<vmem>>, vector<48x128xbf16>
    %cst = arith.constant dense<0.000000e+00> : vector<128x128xf32>
    %2 = tpu.matmul %0, %1, %cst {dimension_numbers = #tpu.dot_dimension_numbers<[1], [0], [0], [1], [0, 0, 1, 1], [], []>} : vector<128x48xbf16>, vector<48x128xbf16>, vector<128x128xf32> -> vector<128x128xf32>
    %c0_3 = arith.constant 0 : index
    %c0_4 = arith.constant 0 : index
    %3 = vector.load %arg3[%c0_3, %c0_4] : memref<1x128xf32, #tpu.memory_space<vmem>>, vector<1x128xf32>
    %4 = vector.broadcast %3 : vector<1x128xf32> to vector<128x128xf32>
    %5 = arith.addf %2, %4 : vector<128x128xf32>
    %cst_5 = arith.constant 0.000000e+00 : f32
    %6 = vector.broadcast %cst_5 : f32 to vector<128x128xf32>
    %7 = arith.maximumf %5, %6 : vector<128x128xf32>
    %8 = arith.truncf %7 : vector<128x128xf32> to vector<128x128xbf16>
    %c0_6 = arith.constant 0 : index
    %c0_7 = arith.constant 0 : index
    %9 = vector.load %arg4[%c0_6, %c0_7] : memref<128x128xbf16, #tpu.memory_space<vmem>>, vector<128x128xbf16>
    %cst_8 = arith.constant dense<0.000000e+00> : vector<128x128xf32>
    %10 = tpu.matmul %8, %9, %cst_8 {dimension_numbers = #tpu.dot_dimension_numbers<[1], [0], [0], [1], [0, 0, 1, 1], [], []>} : vector<128x128xbf16>, vector<128x128xbf16>, vector<128x128xf32> -> vector<128x128xf32>
    %c0_9 = arith.constant 0 : index
    %c0_10 = arith.constant 0 : index
    %11 = vector.load %arg5[%c0_9, %c0_10] : memref<1x128xf32, #tpu.memory_space<vmem>>, vector<1x128xf32>
    %12 = vector.broadcast %11 : vector<1x128xf32> to vector<128x128xf32>
    %13 = arith.addf %10, %12 : vector<128x128xf32>
    %cst_11 = arith.constant 0.000000e+00 : f32
    %14 = vector.broadcast %cst_11 : f32 to vector<128x128xf32>
    %15 = arith.maximumf %13, %14 : vector<128x128xf32>
    %c0_12 = arith.constant 0 : index
    %c0_13 = arith.constant 0 : index
    %16 = vector.load %arg6[%c0_12, %c0_13] : memref<8x128xbf16, #tpu.memory_space<vmem>>, vector<8x128xbf16>
    %17 = arith.truncf %15 : vector<128x128xf32> to vector<128x128xbf16>
    %cst_14 = arith.constant dense<0.000000e+00> : vector<8x128xf32>
    %18 = tpu.matmul %16, %17, %cst_14 {dimension_numbers = #tpu.dot_dimension_numbers<[1], [1], [0], [0], [0, 0, 1, 0], [], []>} : vector<8x128xbf16>, vector<128x128xbf16>, vector<8x128xf32> -> vector<8x128xf32>
    %19 = vector.extract_strided_slice %18 {offsets = [0, 0], sizes = [1, 128], strides = [1, 1]} : vector<8x128xf32> to vector<1x128xf32>
    %c0_15 = arith.constant 0 : index
    %c0_16 = arith.constant 0 : index
    %20 = vector.load %arg7[%c0_15, %c0_16] : memref<1x1xf32, #tpu.memory_space<vmem>>, vector<1x1xf32>
    %21 = vector.broadcast %20 : vector<1x1xf32> to vector<1x128xf32>
    %22 = arith.addf %19, %21 : vector<1x128xf32>
    %cst_17 = arith.constant -3.000000e+01 : f32
    %cst_18 = arith.constant 3.000000e+01 : f32
    %23 = vector.broadcast %cst_17 : f32 to vector<1x128xf32>
    %24 = arith.maximumf %23, %22 : vector<1x128xf32>
    %25 = vector.broadcast %cst_18 : f32 to vector<1x128xf32>
    %26 = arith.minimumf %25, %24 : vector<1x128xf32>
    %cst_19 = arith.constant 0.000000e+00 : f32
    %27 = vector.broadcast %cst_19 : f32 to vector<1x128xf32>
    %28 = arith.subf %27, %26 : vector<1x128xf32>
    %29 = math.exp %28 : vector<1x128xf32>
    %cst_20 = arith.constant 1.000000e+00 : f32
    %30 = vector.broadcast %cst_20 : f32 to vector<1x128xf32>
    %31 = arith.addf %30, %29 : vector<1x128xf32>
    %32 = tpu.reciprocal %31 {approx = true} : vector<1x128xf32> -> vector<1x128xf32>
    %c0_21 = arith.constant 0 : index
    %c0_22 = arith.constant 0 : index
    %33 = vector.load %arg8[%c0_21, %c0_22] : memref<1x128xf32, #tpu.memory_space<vmem>>, vector<1x128xf32>
    tpu.vector_store %arg8[%c0_21, %c0_22], %32 {strides = array<i32>} : memref<1x128xf32, #tpu.memory_space<vmem>>, vector<1x128xf32>,
    return
  }
  func.func @transform_0(%arg0: i32) -> (i32, i32) {
    %c0_i32 = arith.constant 0 : i32
    %c0_i32_0 = arith.constant 0 : i32
    return %arg0, %c0_i32 : i32, i32
  }
  func.func @transform_1(%arg0: i32) -> (i32, i32) {
    %c0_i32 = arith.constant 0 : i32
    %c0_i32_0 = arith.constant 0 : i32
    %c0_i32_1 = arith.constant 0 : i32
    return %c0_i32, %c0_i32_0 : i32, i32
  }
  func.func @transform_2(%arg0: i32) -> (i32, i32) {
    %c0_i32 = arith.constant 0 : i32
    %c0_i32_0 = arith.constant 0 : i32
    %c0_i32_1 = arith.constant 0 : i32
    return %c0_i32, %c0_i32_0 : i32, i32
  }
  func.func @transform_3(%arg0: i32) -> (i32, i32) {
    %c0_i32 = arith.constant 0 : i32
    %c0_i32_0 = arith.constant 0 : i32
    %c0_i32_1 = arith.constant 0 : i32
    return %c0_i32, %c0_i32_0 : i32, i32
  }
  func.func @transform_4(%arg0: i32) -> (i32, i32) {
    %c0_i32 = arith.constant 0 : i32
    %c0_i32_0 = arith.constant 0 : i32
    %c0_i32_1 = arith.constant 0 : i32
    return %c0_i32, %c0_i32_0 : i32, i32
  }
  func.func @transform_5(%arg0: i32) -> (i32, i32) {
    %c0_i32 = arith.constant 0 : i32
    %c0_i32_0 = arith.constant 0 : i32
    %c0_i32_1 = arith.constant 0 : i32
    return %c0_i32, %c0_i32_0 : i32, i32
  }
  func.func @transform_6(%arg0: i32) -> (i32, i32) {
    %c0_i32 = arith.constant 0 : i32
    %c0_i32_0 = arith.constant 0 : i32
    %c0_i32_1 = arith.constant 0 : i32
    return %c0_i32, %c0_i32_0 : i32, i32
  }
  func.func @transform_7(%arg0: i32) -> (i32, i32) {
    %c0_i32 = arith.constant 0 : i32
    %c0_i32_0 = arith.constant 0 : i32
    return %c0_i32, %arg0 : i32, i32
  }
}

</mosaic_0001>

<bundles_post_ra>
// kernel: tpu_custom_call.1
= control target key start
LH: loop header
LB: loop body
LE: loop exit
PB: predicated region body
PF: predicated region fallthrough
CT: control target
= control target key end

     0   :  { %s863_s0 = inlined_call_operand.vmem [shape: bf16[128,48], index: 0, kind: input, shape index: {}]   ;;  %s864_s1 = inlined_call_operand.vmem [shape: bf16[48,128], index: 1, kind: input, shape index: {}]   ;;  %s865_s2 = inlined_call_operand.vmem [shape: f32[1,128], index: 2, kind: input, shape index: {}]   ;;  %s866_s3 = inlined_call_operand.vmem [shape: bf16[128,128], index: 3, kind: input, shape index: {}]   ;;  %s867_s4 = inlined_call_operand.vmem [shape: f32[1,128], index: 4, kind: input, shape index: {}]   ;;  %s868_s5 = inlined_call_operand.vmem [shape: bf16[8,128], index: 5, kind: input, shape index: {}]   ;;  %s869_s6 = inlined_call_operand.<no memory space> [shape: f32[1,1], index: 6, kind: input, shape index: {}]   ;;  %s870_s7 = inlined_call_operand.hbm [shape: f32[1,128], index: 7, kind: output, shape index: {}]  }
   0x1   :  { %v12_v0 = vstv %s869_s6 }
   0x2   :  { %13 = vst [vmem:[#allocation2] sm:$0x1] %v12_v0 }
   0x3   :  { %v674_v1 = vld [vmem:[%s864_s1] sm:$0xff]   ;;  %v675_v2 = vld [vmem:[%s864_s1 + $0x8] sm:$0xff]   ;;  %vm117_vm0 = vcmask 392192   ;;  %v676_v4 = vld [vmem:[%s864_s1 + $0x10] sm:$0xff]  }
   0x4   :  { %595 = vmatprep.subr.bf16.mxu1 %v674_v1  ;;  %v677_v3 = vld [vmem:[%s863_s0] sm:$0xff]   ;;  %v678_v5 = vld [vmem:[%s863_s0 + $0x8] sm:$0xff]   ;;  %v679_v6 = vld [vmem:[%s863_s0 + $0x10] sm:$0xff]  }
   0x5   :  { %596 = vmatpush3.bf16.msra.mxu1 %v674_v1  ;;  %601 = vmatprep.mubr.msk.bf16.mxu1 %vm117_vm0, %v677_v3  ;;  %v685_v7 = vld [vmem:[%s866_s3] sm:$0xff]   ;;  %v686_v8 = vld [vmem:[%s866_s3 + $0x8] sm:$0xff]   ;;  %v687_v9 = vld [vmem:[%s866_s3 + $0x10] sm:$0xff]  }
   0x6   :  { %597 = vmatprep.subr.bf16.mxu1 %v675_v2  ;;  %v680_v10 = vld [vmem:[%s863_s0 + $0x18] sm:$0xff]  }
   0x9   :  { %598 = vmatpush3.bf16.msra.mxu1 %v675_v2 }
   0xa   :  { %599 = vmatprep.subr.bf16.mxu1 %v676_v4 }
   0xd   :  { %600 = vmatpush3.bf16.msra.mxu1 %v676_v4 }
   0xe   :  { %617 = vmatprep.subr.bf16.mxu1 %v685_v7 }
  0x10   :  { %602 = vmatmul.mubr.msk.bf16.vlgmr.msra.gmra.mrb[0].mxu1 %vm117_vm0, %v678_v5 }
  0x11   :  { %605 = vmatprep.mubr.msk.bf16.mxu1 %vm117_vm0, %v679_v6  ;;  %618 = vmatpush3.bf16.msra.mxu1 %v685_v7 }
  0x12   :  { %619 = vmatprep.subr.bf16.mxu1 %v686_v8 }
  0x13   :  { %14 = vsyncpa [#allocation4], 0  ;;  %v681_v11 = vld [vmem:[%s863_s0 + $0x20] sm:$0xff]   ;;  %v688_v12 = vld [vmem:[%s866_s3 + $0x18] sm:$0xff]   ;;  %vm722_vm1 = vmmov 0   ;;  %s724_s17 = smov [#allocation3]  }
  0x14   :  { %v689_v13 = vld [vmem:[%s866_s3 + $0x20] sm:$0xff]   ;;  %v682_v14 = vld [vmem:[%s863_s0 + $0x28] sm:$0xff]   ;;  %v683_v15 = vld [vmem:[%s863_s0 + $0x30] sm:$0xff]  }
  0x15   :  { %620 = vmatpush3.bf16.msra.mxu1 %v686_v8  ;;  %v690_v16 = vld [vmem:[%s866_s3 + $0x28] sm:$0xff]   ;;  %v684_v17 = vld [vmem:[%s863_s0 + $0x38] sm:$0xff]   ;;  %v691_v18 = vld [vmem:[%s866_s3 + $0x30] sm:$0xff]  }
  0x16   :  { %621 = vmatprep.subr.bf16.mxu1 %v687_v9  ;;  %v692_v19 = vld [vmem:[%s866_s3 + $0x38] sm:$0xff]   ;;  %v529_v20 = vld [vmem:[%s865_s2] ss:$0 sm:$0xff] }
  0x18   :  { %606 = vmatmul.mubr.msk.bf16.gmra.mrb[4].mxu1 %vm117_vm0, %v680_v10 }
  0x19   :  { %609 = vmatprep.mubr.msk.bf16.mxu1 %vm117_vm0, %v681_v11  ;;  %622 = vmatpush3.bf16.msra.mxu1 %v687_v9 }
  0x1a   :  { %623 = vmatprep.subr.bf16.mxu1 %v688_v12 }
  0x1d   :  { %624 = vmatpush3.bf16.msra.mxu1 %v688_v12 }
  0x1e   :  { %625 = vmatprep.subr.bf16.mxu1 %v689_v13 }
  0x20   :  { %610 = vmatmul.mubr.msk.bf16.gmra.mrb[8].mxu1 %vm117_vm0, %v682_v14  ;;  %v496_v14 = vld [vmem:[#allocation2] sm:$0x1] }
  0x21   :  { %613 = vmatprep.mubr.msk.bf16.mxu1 %vm117_vm0, %v683_v15  ;;  %626 = vmatpush3.bf16.msra.mxu1 %v689_v13  ;;  %v721_v13 = vmov 0.0   ;;  %v723_v15 = vmov 0  }
  0x22   :  { %627 = vmatprep.subr.bf16.mxu1 %v690_v16  ;;  %649 = vmatprep.subr.bf16.mxu0 %v721_v13 }
  0x23   :  { %665 = vmatprep.mubr.msk.bf16.mxu0 %vm722_vm1, %v721_v13  ;;  %673 = vset.pattern.permute.xlu0 %v723_v15 }
  0x24   :  { %499 = vperm.xlu0 %673, %v496_v14  }
  0x25   :  { %628 = vmatpush3.bf16.msra.mxu1 %v690_v16  ;;  %v549_v16 = vld [vmem:[%s867_s4] ss:$0 sm:$0xff] }
  0x26   :  { %629 = vmatprep.subr.bf16.mxu1 %v691_v18 }
  0x28   :  { %614 = vmatmul.mubr.msk.bf16.gmra.mrb[12].mxu1 %vm117_vm0, %v684_v17 }
  0x29   :  { %630 = vmatpush3.bf16.msra.mxu1 %v691_v18 }
  0x2a   :  { %631 = vmatprep.subr.bf16.mxu1 %v692_v19 }
  0x2d   :  { %632 = vmatpush3.bf16.msra.mxu1 %v692_v19 }
  0xa3   :  { %v500_v14 = vpop.permute.xlu0 %499 }
  0xe3   :  { %v603_v21 = vpop.f32.mrb[0].mxu1 }
  0xe4   :  { %v185_v22 = vadd.f32 %v603_v21, %v529_v20  ;;  %v176_v23 = vpop.f32.mrb[1].mxu1 }
  0xe5   :  { %v177_v24 = vadd.f32 %v529_v20, %v176_v23  ;;  %v604_v25 = vpop.f32.mrb[2].mxu1 }
  0xe6   :  { %v188_v26 = vadd.f32 %v604_v25, %v529_v20  ;;  %v179_v27 = vpop.f32.mrb[3].mxu1  ;;  %v241_v29 = vmax.f32 %v185_v22, 0.0 }
  0xe7   :  { %v180_v28 = vadd.f32 %v529_v20, %v179_v27  ;;  %v239_v31 = vmax.f32 %v177_v24, 0.0 }
  0xe8   :  { %v242_v30 = vmax.f32 %v188_v26, 0.0 }
  0xe9   :  { %v240_v32 = vmax.f32 %v180_v28, 0.0 }
  0xea   :  { %v256_v33 = vpack.c.bf16 %v242_v30, %v241_v29 }
  0xeb   :  { %v255_v34 = vpack.c.bf16 %v240_v32, %v239_v31  ;;  %v607_v35 = vpop.f32.mrb[4].mxu1 }
  0xec   :  { %v201_v36 = vadd.f32 %v607_v35, %v529_v20  ;;  %v192_v37 = vpop.f32.mrb[5].mxu1 }
  0xed   :  { %v193_v38 = vadd.f32 %v529_v20, %v192_v37  ;;  %633 = vmatprep.mubr.bf16.mxu1 %v255_v34  ;;  %v608_v39 = vpop.f32.mrb[6].mxu1 }
  0xee   :  { %v245_v40 = vmax.f32 %v201_v36, 0.0  ;;  %v204_v41 = vadd.f32 %v608_v39, %v529_v20  ;;  %634 = vmatmul.mubr.bf16.vlgmr.msra.gmra.mrb[16].mxu1 %v256_v33  ;;  %v195_v42 = vpop.f32.mrb[7].mxu1 }
  0xef   :  { %v243_v43 = vmax.f32 %v193_v38, 0.0  ;;  %v196_v44 = vadd.f32 %v529_v20, %v195_v42 }
  0xf0   :  { %v246_v45 = vmax.f32 %v204_v41, 0.0 }
  0xf1   :  { %v244_v46 = vmax.f32 %v196_v44, 0.0 }
  0xf2   :  { %v258_v47 = vpack.c.bf16 %v246_v45, %v245_v40 }
  0xf3   :  { %v257_v48 = vpack.c.bf16 %v244_v46, %v243_v43  ;;  %v611_v49 = vpop.f32.mrb[8].mxu1 }
  0xf4   :  { %v217_v50 = vadd.f32 %v611_v49, %v529_v20  ;;  %v208_v51 = vpop.f32.mrb[9].mxu1 }
  0xf5   :  { %637 = vmatprep.mubr.bf16.mxu1 %v257_v48  ;;  %v209_v52 = vadd.f32 %v529_v20, %v208_v51  ;;  %v612_v53 = vpop.f32.mrb[10].mxu1 }
  0xf6   :  { %638 = vmatmul.mubr.bf16.gmra.mrb[20].mxu1 %v258_v47  ;;  %v249_v54 = vmax.f32 %v217_v50, 0.0  ;;  %v220_v55 = vadd.f32 %v612_v53, %v529_v20  ;;  %v211_v56 = vpop.f32.mrb[11].mxu1 }
  0xf7   :  { %v247_v57 = vmax.f32 %v209_v52, 0.0  ;;  %v212_v58 = vadd.f32 %v529_v20, %v211_v56 }
  0xf8   :  { %v250_v59 = vmax.f32 %v220_v55, 0.0 }
  0xf9   :  { %v248_v60 = vmax.f32 %v212_v58, 0.0 }
  0xfa   :  { %v260_v61 = vpack.c.bf16 %v250_v59, %v249_v54 }
  0xfb   :  { %v259_v62 = vpack.c.bf16 %v248_v60, %v247_v57  ;;  %v615_v63 = vpop.f32.mrb[12].mxu1 }
  0xfc   :  { %v233_v0 = vadd.f32 %v615_v63, %v529_v20  ;;  %v224_v1 = vpop.f32.mrb[13].mxu1 }
  0xfd   :  { %641 = vmatprep.mubr.bf16.mxu1 %v259_v62  ;;  %v225_v2 = vadd.f32 %v529_v20, %v224_v1  ;;  %v616_v3 = vpop.f32.mrb[14].mxu1 }
  0xfe   :  { %642 = vmatmul.mubr.bf16.gmra.mrb[24].mxu1 %v260_v61  ;;  %v253_v4 = vmax.f32 %v233_v0, 0.0  ;;  %v236_v5 = vadd.f32 %v616_v3, %v529_v20  ;;  %v227_v6 = vpop.f32.mrb[15].mxu1 }
  0xff   :  { %v251_v7 = vmax.f32 %v225_v2, 0.0  ;;  %v228_v8 = vadd.f32 %v529_v20, %v227_v6 }
 0x100   :  { %v254_v9 = vmax.f32 %v236_v5, 0.0 }
 0x101   :  { %v252_v10 = vmax.f32 %v228_v8, 0.0 }
 0x102   :  { %v262_v11 = vpack.c.bf16 %v254_v9, %v253_v4  ;;  %v447_v9 = vld [vmem:[%s868_s5] sm:$0xf]  ;;  %s521_s5 = sshll.u32 %s724_s17, 4  ;;  %s522_s5 = int_to_ptr.vmem [resolvable:$true] %s521_s5 }
 0x103   :  { %v261_v12 = vpack.c.bf16 %v252_v10, %v251_v7  ;;  %v502_v10 = vlaneseq  ;;  %s697_s1 = scalar_lea.vmem %s522_s5, 16  ;;  %s701_s18 = scalar_lea.vmem %s522_s5, 32 }
 0x104   :  { %p698_p0 = scmp.ne.s32.totalorder %s522_s5, %s697_s1  ;;  %p702_p1 = scmp.lt.s32.totalorder %s522_s5, %s522_s5 }
 0x105   :  { %645 = vmatprep.mubr.bf16.mxu1 %v261_v12  ;;  %p703_p2 = scmp.lt.s32.totalorder %s701_s18, %s697_s1 }
 0x106   :  { %646 = vmatmul.mubr.bf16.gmra.mrb[28].mxu1 %v262_v11  ;;  %v503_v11 = vshrl.u32 %v502_v10, 7 }
 0x107   :  { %p704_p3 = por %p703_p2, %p702_p1 }
 0x108   :  { %v504_v12 = vsub.s32 0, %v503_v11 }
 0x109   :  { %p705_p4 = pnand %p704_p3, %p698_p0 }
 0x10a   :  { %v505_v15 = vrot.slane %v500_v14, %v504_v12 }
 0x1c1   :  { %v635_v17 = vpop.f32.mrb[16].mxu1 }
 0x1c2   :  { %v377_v18 = vadd.f32 %v635_v17, %v549_v16  ;;  %v368_v19 = vpop.f32.mrb[17].mxu1 }
 0x1c3   :  { %v369_v20 = vadd.f32 %v549_v16, %v368_v19  ;;  %v636_v21 = vpop.f32.mrb[18].mxu1 }
 0x1c4   :  { %v380_v22 = vadd.f32 %v636_v21, %v549_v16  ;;  %v371_v23 = vpop.f32.mrb[19].mxu1  ;;  %v433_v25 = vmax.f32 %v377_v18, 0.0 }
 0x1c5   :  { %v372_v24 = vadd.f32 %v549_v16, %v371_v23  ;;  %v431_v27 = vmax.f32 %v369_v20, 0.0 }
 0x1c6   :  { %v434_v26 = vmax.f32 %v380_v22, 0.0 }
 0x1c7   :  { %v432_v28 = vmax.f32 %v372_v24, 0.0 }
 0x1c8   :  { %v449_v29 = vpack.c.bf16 %v434_v26, %v433_v25 }
 0x1c9   :  { %v639_v30 = vpop.f32.mrb[20].mxu1  ;;  %v448_v31 = vpack.c.bf16 %v432_v28, %v431_v27 }
 0x1ca   :  { %v393_v32 = vadd.f32 %v639_v30, %v549_v16  ;;  %v384_v33 = vpop.f32.mrb[21].mxu1 }
 0x1cb   :  { %v385_v34 = vadd.f32 %v549_v16, %v384_v33  ;;  %650 = vmatpush3.bf16.xpose.msra.mxu0 %v448_v31  ;;  %v640_v35 = vpop.f32.mrb[22].mxu1 }
 0x1cc   :  { %v437_v36 = vmax.f32 %v393_v32, 0.0  ;;  %v396_v37 = vadd.f32 %v640_v35, %v549_v16  ;;  %v387_v38 = vpop.f32.mrb[23].mxu1  ;;  %651 = vmatprep.subr.bf16.mxu0 %v721_v13 }
 0x1cd   :  { %v435_v39 = vmax.f32 %v385_v34, 0.0  ;;  %v388_v40 = vadd.f32 %v549_v16, %v387_v38 }
 0x1ce   :  { %v438_v41 = vmax.f32 %v396_v37, 0.0 }
 0x1cf   :  { %v436_v42 = vmax.f32 %v388_v40, 0.0 }
 0x1d0   :  { %v451_v43 = vpack.c.bf16 %v438_v41, %v437_v36 }
 0x1d1   :  { %v450_v44 = vpack.c.bf16 %v436_v42, %v435_v39  ;;  %v643_v45 = vpop.f32.mrb[24].mxu1 }
 0x1d2   :  { %v409_v46 = vadd.f32 %v643_v45, %v549_v16  ;;  %v400_v47 = vpop.f32.mrb[25].mxu1 }
 0x1d3   :  { %652 = vmatpush3.bf16.xpose.msra.mxu0 %v449_v29  ;;  %v401_v48 = vadd.f32 %v549_v16, %v400_v47  ;;  %v644_v49 = vpop.f32.mrb[26].mxu1 }
 0x1d4   :  { %v441_v50 = vmax.f32 %v409_v46, 0.0  ;;  %653 = vmatprep.subr.bf16.mxu0 %v721_v13  ;;  %v412_v51 = vadd.f32 %v644_v49, %v549_v16  ;;  %v403_v52 = vpop.f32.mrb[27].mxu1 }
 0x1d5   :  { %v439_v53 = vmax.f32 %v401_v48, 0.0  ;;  %v404_v54 = vadd.f32 %v549_v16, %v403_v52 }
 0x1d6   :  { %v442_v55 = vmax.f32 %v412_v51, 0.0 }
 0x1d7   :  { %v440_v56 = vmax.f32 %v404_v54, 0.0 }
 0x1d8   :  { %v453_v57 = vpack.c.bf16 %v442_v55, %v441_v50 }
 0x1d9   :  { %v452_v58 = vpack.c.bf16 %v440_v56, %v439_v53  ;;  %v647_v59 = vpop.f32.mrb[28].mxu1 }
 0x1da   :  { %v425_v60 = vadd.f32 %v647_v59, %v549_v16  ;;  %v416_v61 = vpop.f32.mrb[29].mxu1 }
 0x1db   :  { %654 = vmatpush3.bf16.xpose.msra.mxu0 %v450_v44  ;;  %v417_v62 = vadd.f32 %v549_v16, %v416_v61  ;;  %v648_v63 = vpop.f32.mrb[30].mxu1 }
 0x1dc   :  { %655 = vmatprep.subr.bf16.mxu0 %v721_v13  ;;  %v445_v0 = vmax.f32 %v425_v60, 0.0  ;;  %v428_v1 = vadd.f32 %v648_v63, %v549_v16  ;;  %v419_v2 = vpop.f32.mrb[31].mxu1 }
 0x1dd   :  { %v443_v3 = vmax.f32 %v417_v62, 0.0  ;;  %v420_v4 = vadd.f32 %v549_v16, %v419_v2 }
 0x1de   :  { %v446_v5 = vmax.f32 %v428_v1, 0.0 }
 0x1df   :  { %v444_v6 = vmax.f32 %v420_v4, 0.0 }
 0x1e0   :  { %v455_v7 = vpack.c.bf16 %v446_v5, %v445_v0 }
 0x1e1   :  { %v454_v8 = vpack.c.bf16 %v444_v6, %v443_v3 }
 0x1e3   :  { %656 = vmatpush3.bf16.xpose.msra.mxu0 %v451_v43 }
 0x1e4   :  { %657 = vmatprep.subr.bf16.mxu0 %v721_v13 }
 0x1eb   :  { %658 = vmatpush3.bf16.xpose.msra.mxu0 %v452_v58 }
 0x1ec   :  { %659 = vmatprep.subr.bf16.mxu0 %v721_v13 }
 0x1f3   :  { %660 = vmatpush3.bf16.xpose.msra.mxu0 %v453_v57 }
 0x1f4   :  { %661 = vmatprep.subr.bf16.mxu0 %v721_v13 }
 0x1fb   :  { %662 = vmatpush3.bf16.xpose.msra.mxu0 %v454_v8 }
 0x1fc   :  { %663 = vmatprep.subr.bf16.mxu0 %v721_v13 }
 0x203   :  { %664 = vmatpush3.bf16.xpose.msra.mxu0 %v455_v7 }
 0x20a   :  { %666 = vmatmul.mubr.bf16.vlgmr.msra.gmra.mrb[0].mxu0 %v447_v9 }
 0x2dd   :  { %v490_v16 = vpop.f32.mrb[0].mxu0 }
 0x2de   :  { %v506_v17 = vadd.f32 %v505_v15, %v490_v16  ;;  %v667_v18 = vpop.f32.mrb[1].mxu0 }
 0x2df   :  { %v493_v19 = vpop.f32.mrb[2].mxu0 }
 0x2e0   :  { %v558_v20 = vclamps-f32 %v506_v17, 30.0  ;;  %v668_v21 = vpop.f32.mrb[3].mxu0 }
 0x2e2   :  { %v509_v22 = vsub.f32 0.0, %v558_v20 }
 0x2e4   :  { %v510_v23 = vmul.f32 1.442695, %v509_v22 }
 0x2e6   :  { %693 = vpow2.f32 %v510_v23 }
 0x2f0   :  { %v694_v13 = vpop.eup %693 }
 0x2f1   :  { %v512_v24 = vadd.f32 1.0, %v694_v13 }
 0x2f3   :  { %695 = vrcp.f32 %v512_v24 }
 0x2fd   :  { %v696_v25 = vpop.eup %695 }
 0x2fe   :  { %514 = vst [vmem:[#allocation3] sm:$0x1] %v696_v25 }
 0x2ff   :  { %708 = shalt.err (!%p705_p4)
}
 0x300   :  { %s709_s21 = scalar_lea.hbm %s870_s7, 16 }
 0x301   :  { %p710_p5 = scmp.ne.s32.totalorder %s870_s7, %s709_s21  ;;  %p713_p6 = scmp.lt.u32.totalorder %s709_s21, %s870_s7 }
 0x303   :  { %p715_p7 = pnand %p713_p6, %p710_p5 }
 0x305   :  { %718 = shalt.err (!%p715_p7)
}
 0x306   :  { %524 = dma.vmem_to_hbm [thread:$0]  %s522_s5, 16, %s870_s7, [#allocation4]  }
 0x307   :  { %719 = dma.done.wait [#allocation4], 16  }
 0x308   :  { %720 = vsyncadd [#allocation4], 4294967280 }
 0x309   :  { %528 = vsyncpa [#allocation4], 1 }

</bundles_post_ra>
